<compile_context>
chip_gen: v7x
topology: tpu7x:2x2x1
jax: 0.10.0
libtpu: 0.0.40
codegen_flags: <defaults>
</compile_context>

<pallas_src>
import jax
import jax.numpy as jnp
from jax.experimental import pallas as pl
from jax.experimental.pallas import tpu as pltpu


def se_kernel(x_ref, w1t_ref, w2t_ref, o_ref):
    # x_ref / o_ref: (bt, C, HW)   w1t_ref: (C, Cr) f32   w2t_ref: (Cr, C) f32
    hw = x_ref.shape[-1]
    inv_hw = 1.0 / hw
    # Global average pool over spatial dim; accumulate in f32.
    pooled = jnp.sum(x_ref[...].astype(jnp.float32), axis=-1) * inv_hw   # (bt, C)
    # fc1 (no bias) + LeakyReLU(0.2)
    h = jnp.dot(pooled, w1t_ref[...], preferred_element_type=jnp.float32)
    h = jnp.where(h > 0, h, 0.2 * h)                                      # (bt, Cr)
    # fc2 (no bias) + sigmoid, all in f32 (stable for both signs)
    z = jnp.dot(h, w2t_ref[...], preferred_element_type=jnp.float32)      # (bt, C)
    s = 1.0 / (1.0 + jnp.exp(-z))
    # Re-read x (don't keep the tile live across the FC chain); multiply in f32,
    # single cast at the store. Lane-dense store when HW % 128 == 0.
    o_ref[...] = (x_ref[...] * s[:, :, None]).astype(o_ref.dtype)


def _tpu_vmem_and_cores():
    """Physical VMEM bytes and TensorCores/chip, with conservative fallbacks."""
    vmem_cap = 64 << 20   # conservative fallback (v7x per-TC VMEM)
    num_cores = 1
    try:
        info = pltpu.get_tpu_info()
        vmem_cap = int(getattr(info, "vmem_capacity_bytes", vmem_cap))
        for name in ("num_cores", "tensorcores_per_chip", "cores_per_chip"):
            v = getattr(info, name, None)
            if v:
                num_cores = int(v)
                break
    except Exception:
        pass
    try:
        d = jax.devices()[0]
        num_cores = max(num_cores, int(getattr(d, "num_cores", 1) or 1))
    except Exception:
        pass
    return vmem_cap, num_cores


def se_layer(x, w1, w2, *, block_budget_bytes=None):
    """x: (B, C, H, W). w1: (Cr, C), w2: (C, Cr) in PyTorch nn.Linear layout
    (out_features, in_features)."""
    B, C, H, W = x.shape
    HW = H * W
    Cr = w1.shape[0]
    assert w1.shape == (Cr, C) and w2.shape == (C, Cr)

    x_flat = x.reshape(B, C, HW)
    # Pre-transpose and pre-cast weights once in the wrapper (resident in VMEM).
    w1t = w1.T.astype(jnp.float32)   # (C, Cr)
    w2t = w2.T.astype(jnp.float32)   # (Cr, C)
    weight_bytes = (w1t.size + w2t.size) * 4

    itemsize = jnp.dtype(x.dtype).itemsize
    vmem_cap, num_cores = _tpu_vmem_and_cores()

    # ~3/8 of physical VMEM for the double-buffered in+out streaming working set,
    # hard-capped so (working set + weights + slack) stays under ~80% of VMEM.
    if block_budget_bytes is None:
        block_budget_bytes = (vmem_cap * 3) // 8
    per_b = 4 * C * HW * itemsize                    # 2 buffers x (in + out) per image
    hard_cap = int(vmem_cap * 0.8) - 2 * weight_bytes - (2 << 20)
    budget = min(int(block_budget_bytes), max(hard_cap, per_b))
    bt = max(1, min(B, budget // max(per_b, 1)))

    # Grid steps: single step on 1-TC chips; on multi-TC chips round the step
    # count to a multiple of the core count so megacore sharding is balanced.
    steps = pl.cdiv(B, bt)
    if num_cores > 1 and B > 1:
        steps = max(steps, num_cores)
        steps = -(-steps // num_cores) * num_cores
        steps = min(steps, B)
        bt = pl.cdiv(B, steps)
        steps = pl.cdiv(B, bt)
    grid = (steps,)

    # VMEM limit coupled to the chosen tile (never a fixed constant).
    vmem_need = per_b * bt + 2 * weight_bytes + (2 << 20)
    vmem_limit = int(min(max(vmem_need, 16 << 20), int(vmem_cap * 0.85)))

    cost = pl.CostEstimate(
        flops=int(4 * B * C * Cr + 2 * B * C * HW),
        transcendentals=int(B * C),
        bytes_accessed=int(2 * B * C * HW * itemsize + weight_bytes),
    )

    out_flat = pl.pallas_call(
        se_kernel,
        out_shape=jax.ShapeDtypeStruct((B, C, HW), x.dtype),
        grid_spec=pltpu.PrefetchScalarGridSpec(
            num_scalar_prefetch=0,
            grid=grid,
            in_specs=[
                pl.BlockSpec((bt, C, HW), lambda b: (b, 0, 0)),
                pl.BlockSpec((C, Cr), lambda b: (0, 0)),   # weights stay resident
                pl.BlockSpec((Cr, C), lambda b: (0, 0)),
            ],
            out_specs=pl.BlockSpec((bt, C, HW), lambda b: (b, 0, 0)),
        ),
        compiler_params=pltpu.CompilerParams(
            dimension_semantics=("parallel",),
            vmem_limit_bytes=vmem_limit,
        ),
        cost_estimate=cost,
    )(x_flat, w1t, w2t)
    return out_flat.reshape(B, C, H, W)


def se_layer_ref(x, w1, w2):
    """Pure-JAX reference mirroring the PyTorch forward."""
    y = jnp.mean(x, axis=(2, 3))                   # (B, C)
    y = y @ w1.T                                   # (B, Cr)
    y = jnp.where(y > 0, y, 0.2 * y)               # LeakyReLU(0.2)
    y = y @ w2.T                                   # (B, C)
    y = jax.nn.sigmoid(y)
    return x * y[:, :, None, None]


if __name__ == "__main__":
    key = jax.random.PRNGKey(0)
    kx, k1, k2, kx2 = jax.random.split(key, 4)

    # Shapes consistent with SELayer(in_channel=32, out_channel=32, reduction=16)
    B, C, H, W = 8, 32, 16, 16       # HW = 256 -> lane-dense (multiple of 128)
    Cr = C // 16                     # 2
    x = jax.random.normal(kx, (B, C, H, W), dtype=jnp.float32)
    w1 = jax.random.normal(k1, (Cr, C), dtype=jnp.float32) * 0.1   # (out, in)
    w2 = jax.random.normal(k2, (C, Cr), dtype=jnp.float32) * 0.1

    out = jax.block_until_ready(se_layer(x, w1, w2))
    ref = se_layer_ref(x, w1, w2)
    assert jnp.allclose(out, ref, atol=1e-5, rtol=1e-5), "mismatch vs reference"

    # Robustness check: non-dividing batch + non-lane-dense HW + multi-step grid
    # (small forced budget -> bt=2 over B=3, partial last block).
    B2, H2, W2 = 3, 14, 14
    x2 = jax.random.normal(kx2, (B2, C, H2, W2), dtype=jnp.float32)
    per_b2 = 4 * C * H2 * W2 * 4
    out2 = jax.block_until_ready(se_layer(x2, w1, w2, block_budget_bytes=2 * per_b2))
    ref2 = se_layer_ref(x2, w1, w2)
    assert jnp.allclose(out2, ref2, atol=1e-5, rtol=1e-5), "mismatch vs reference (tiled)"

    print("KERNEL_OK")
</pallas_src>

<mosaic_0001>
module attributes {stable_mosaic.version = 11 : i64} {
  func.func @se_kernel(%arg0: i32, %arg1: memref<8x32x256xf32, #tpu.memory_space<vmem>>, %arg2: memref<32x2xf32, #tpu.memory_space<vmem>>, %arg3: memref<2x32xf32, #tpu.memory_space<vmem>>, %arg4: memref<8x32x256xf32, #tpu.memory_space<vmem>>) attributes {dimension_semantics = [#tpu.dimension_semantics<parallel>], iteration_bounds = array<i64: 1>, scalar_prefetch = 0 : i64, scratch_operands = 0 : i64, tpu.core_type = #tpu.core_type<tc>, window_params = [{transform_indices = @transform_0, window_bounds = array<i64: 8, 32, 256>}, {pipeline_mode = #tpu.pipeline_mode<synchronous>, transform_indices = @transform_1, window_bounds = array<i64: 32, 2>}, {pipeline_mode = #tpu.pipeline_mode<synchronous>, transform_indices = @transform_2, window_bounds = array<i64: 2, 32>}, {transform_indices = @transform_3, window_bounds = array<i64: 8, 32, 256>}]} {
    %c0 = arith.constant 0 : index
    %c0_0 = arith.constant 0 : index
    %c0_1 = arith.constant 0 : index
    %0 = vector.load %arg1[%c0, %c0_0, %c0_1] : memref<8x32x256xf32, #tpu.memory_space<vmem>>, vector<8x32x256xf32>
    %cst = arith.constant dense<0.000000e+00> : vector<8x32xf32>
    %1 = vector.multi_reduction <add>, %0, %cst [2] : vector<8x32x256xf32> to vector<8x32xf32>
    %cst_2 = arith.constant 3.906250e-03 : f32
    %2 = vector.broadcast %cst_2 : f32 to vector<8x32xf32>
    %3 = arith.mulf %1, %2 : vector<8x32xf32>
    %c0_3 = arith.constant 0 : index
    %c0_4 = arith.constant 0 : index
    %4 = vector.load %arg2[%c0_3, %c0_4] : memref<32x2xf32, #tpu.memory_space<vmem>>, vector<32x2xf32>
    %cst_5 = arith.constant dense<0.000000e+00> : vector<8x2xf32>
    %5 = tpu.matmul %3, %4, %cst_5 {dimension_numbers = #tpu.dot_dimension_numbers<[1], [0], [0], [1], [0, 0, 1, 1], [], []>} : vector<8x32xf32>, vector<32x2xf32>, vector<8x2xf32> -> vector<8x2xf32>
    %cst_6 = arith.constant 0.000000e+00 : f32
    %6 = vector.broadcast %cst_6 : f32 to vector<8x2xf32>
    %7 = arith.cmpf ogt, %5, %6 : vector<8x2xf32>
    %cst_7 = arith.constant 2.000000e-01 : f32
    %8 = vector.broadcast %cst_7 : f32 to vector<8x2xf32>
    %9 = arith.mulf %8, %5 : vector<8x2xf32>
    %10 = arith.select %7, %5, %9 : vector<8x2xi1>, vector<8x2xf32>
    %c0_8 = arith.constant 0 : index
    %c0_9 = arith.constant 0 : index
    %11 = vector.load %arg3[%c0_8, %c0_9] : memref<2x32xf32, #tpu.memory_space<vmem>>, vector<2x32xf32>
    %cst_10 = arith.constant dense<0.000000e+00> : vector<8x32xf32>
    %12 = tpu.matmul %10, %11, %cst_10 {dimension_numbers = #tpu.dot_dimension_numbers<[1], [0], [0], [1], [0, 0, 1, 1], [], []>} : vector<8x2xf32>, vector<2x32xf32>, vector<8x32xf32> -> vector<8x32xf32>
    %cst_11 = arith.constant 0.000000e+00 : f32
    %13 = vector.broadcast %cst_11 : f32 to vector<8x32xf32>
    %14 = arith.subf %13, %12 : vector<8x32xf32>
    %15 = math.exp %14 : vector<8x32xf32>
    %cst_12 = arith.constant 1.000000e+00 : f32
    %16 = vector.broadcast %cst_12 : f32 to vector<8x32xf32>
    %17 = arith.addf %16, %15 : vector<8x32xf32>
    %cst_13 = arith.constant 1.000000e+00 : f32
    %18 = vector.broadcast %cst_13 : f32 to vector<8x32xf32>
    %19 = arith.divf %18, %17 : vector<8x32xf32>
    %c0_14 = arith.constant 0 : index
    %c0_15 = arith.constant 0 : index
    %c0_16 = arith.constant 0 : index
    %20 = vector.load %arg1[%c0_14, %c0_15, %c0_16] : memref<8x32x256xf32, #tpu.memory_space<vmem>>, vector<8x32x256xf32>
    %21 = vector.shape_cast %19 : vector<8x32xf32> to vector<8x32x1xf32>
    %22 = vector.broadcast %21 : vector<8x32x1xf32> to vector<8x32x256xf32>
    %23 = arith.mulf %20, %22 : vector<8x32x256xf32>
    %c0_17 = arith.constant 0 : index
    %c0_18 = arith.constant 0 : index
    %c0_19 = arith.constant 0 : index
    %24 = vector.load %arg4[%c0_17, %c0_18, %c0_19] : memref<8x32x256xf32, #tpu.memory_space<vmem>>, vector<8x32x256xf32>
    tpu.vector_store %arg4[%c0_17, %c0_18, %c0_19], %23 {strides = array<i32>} : memref<8x32x256xf32, #tpu.memory_space<vmem>>, vector<8x32x256xf32>,
    return
  }
  func.func @transform_0(%arg0: i32) -> (i32, i32, i32) {
    %c0_i32 = arith.constant 0 : i32
    %c0_i32_0 = arith.constant 0 : i32
    %c0_i32_1 = arith.constant 0 : i32
    return %arg0, %c0_i32, %c0_i32_0 : i32, i32, i32
  }
  func.func @transform_1(%arg0: i32) -> (i32, i32) {
    %c0_i32 = arith.constant 0 : i32
    %c0_i32_0 = arith.constant 0 : i32
    %c0_i32_1 = arith.constant 0 : i32
    return %c0_i32, %c0_i32_0 : i32, i32
  }
  func.func @transform_2(%arg0: i32) -> (i32, i32) {
    %c0_i32 = arith.constant 0 : i32
    %c0_i32_0 = arith.constant 0 : i32
    %c0_i32_1 = arith.constant 0 : i32
    return %c0_i32, %c0_i32_0 : i32, i32
  }
  func.func @transform_3(%arg0: i32) -> (i32, i32, i32) {
    %c0_i32 = arith.constant 0 : i32
    %c0_i32_0 = arith.constant 0 : i32
    %c0_i32_1 = arith.constant 0 : i32
    return %arg0, %c0_i32, %c0_i32_0 : i32, i32, i32
  }
}

</mosaic_0001>

<bundles_post_ra>
// kernel: tpu_custom_call.1
= control target key start
LH: loop header
LB: loop body
LE: loop exit
PB: predicated region body
PF: predicated region fallthrough
CT: control target
= control target key end

     0   :  { %8 = vsyncpa [#allocation3], 0  ;;  %s1395_s0 = inlined_call_operand.hbm [shape: f32[8,32,256], index: 0, kind: input, shape index: {}]   ;;  %s1396_s1 = inlined_call_operand.vmem [shape: f32[32,2], index: 1, kind: input, shape index: {}]   ;;  %s1397_s2 = inlined_call_operand.vmem [shape: f32[2,32], index: 2, kind: input, shape index: {}]   ;;  %s1398_s3 = inlined_call_operand.hbm [shape: f32[8,32,256], index: 3, kind: output, shape index: {}]  }
   0x1   :  { %9 = vsyncpa [#allocation4], 0  ;;  %s980_s12 = smov [#allocation2]   ;;  %s932_s16 = scalar_lea.hbm %s1395_s0, 8192 }
   0x2   :  { %s15_s13 = sshll.u32 %s980_s12, 4  ;;  %p933_p0 = scmp.ne.s32.totalorder %s1395_s0, %s932_s16  ;;  %s16_s13 = int_to_ptr.vmem [resolvable:$true] %s15_s13 }
   0x3   :  { %p936_p1 = scmp.lt.u32.totalorder %s932_s16, %s1395_s0 }
   0x5   :  { %p938_p2 = pnand %p936_p1, %p933_p0 }
   0x7   :  { %941 = shalt.err (!%p938_p2)
}
   0x8   :  { %s942_s21 = scalar_lea.vmem %s16_s13, 8192  ;;  %p947_p4 = scmp.lt.s32.totalorder %s16_s13, %s16_s13 }
   0x9   :  { %p943_p3 = scmp.ne.s32.totalorder %s16_s13, %s942_s21  ;;  %p948_p5 = scmp.lt.s32.totalorder %s942_s21, %s942_s21 }
   0xb   :  { %p949_p6 = por %p948_p5, %p947_p4 }
   0xd   :  { %p950_p7 = pnand %p949_p6, %p943_p3 }
   0xf   :  { %953 = shalt.err (!%p950_p7)
}
  0x10   :  { %s981_s22 = smov 256   ;;  %s982_s23 = smov 16  }
  0x11   :  { %21 = dma.hbm_to_vmem [thread:$0]  %s1395_s0, 8192, %s16_s13, [#allocation3], %s981_s22, %s981_s22, %s982_s23  }
  0x12   :  { %976 = dma.done.wait [#allocation3], 8192  }
  0x13   :  { %977 = vsyncadd [#allocation3], 4294959104  ;;  %v1022_v0 = vld [vmem:[#allocation2 + $0x40] sm:$0xff]  ;;  %v1024_v1 = vld [vmem:[#allocation2 + $0x48] sm:$0xff]  ;;  %vm984_vm0 = vmmov 0   ;;  %vm268_vm1 = vcmask 130112  }
  0x14   :  { %v1026_v2 = vld [vmem:[#allocation2] sm:$0xff]  ;;  %v105_v3 = vadd.f32 %v1024_v1, %v1022_v0  ;;  %v1030_v4 = vld [vmem:[#allocation2 + $0x8] sm:$0xff]  ;;  %v1032_v5 = vld [vmem:[#allocation2 + $0x50] sm:$0xff]  ;;  %vm275_vm2 = vcmask 195712   ;;  %vm282_vm3 = vcmask 261312   ;;  %vm417_vm4 = vcmask 1041409  }
  0x15   :  { %v1034_v6 = vld [vmem:[#allocation2 + $0x58] sm:$0xff]  ;;  %v93_v7 = vadd.f32 %v1030_v4, %v1026_v2  ;;  %v1038_v8 = vld [vmem:[#allocation2 + $0x10] sm:$0xff]  ;;  %v1046_v12 = vld [vmem:[#allocation2 + $0x60] sm:$0xff]  ;;  %vm419_vm5 = vcmask 1042434   ;;  %vm421_vm6 = vcmask 1043459   ;;  %vm423_vm7 = vcmask 1044484  }
  0x16   :  { %v1040_v9 = vld [vmem:[#allocation2 + $0x18] sm:$0xff]  ;;  %106 = vadd.xlane.f32.xlu1 %v105_v3  ;;  %v108_v10 = vadd.f32 %v1034_v6, %v1032_v5  ;;  %v1048_v13 = vld [vmem:[#allocation2 + $0x68] sm:$0xff]  ;;  %v1050_v14 = vld [vmem:[#allocation2 + $0x20] sm:$0xff]  ;;  %vm425_vm8 = vcmask 1045509   ;;  %vm427_vm9 = vcmask 1046534   ;;  %vm429_vm10 = vcmask 1047559  }
  0x17   :  { %94 = vadd.xlane.f32.xlu0 %v93_v7  ;;  %v96_v11 = vadd.f32 %v1040_v9, %v1038_v8  ;;  %v1052_v15 = vld [vmem:[#allocation2 + $0x28] sm:$0xff]  ;;  %v111_v16 = vadd.f32 %v1048_v13, %v1046_v12  ;;  %v1058_v18 = vld [vmem:[#allocation2 + $0x90] sm:$0xff]  ;;  %v1060_v19 = vld [vmem:[#allocation2 + $0x98] sm:$0xff]  ;;  %vm431_vm11 = vcmask 261120   ;;  %vm512_vm12 = vcmask 1041408  }
  0x18   :  { %v99_v17 = vadd.f32 %v1052_v15, %v1050_v14  ;;  %v1062_v20 = vld [vmem:[#allocation2 + $0x80] sm:$0xff]  ;;  %v1064_v21 = vld [vmem:[#allocation2 + $0x88] sm:$0xff]  ;;  %v120_v22 = vadd.f32 %v1060_v19, %v1058_v18  ;;  %v1070_v24 = vld [vmem:[#allocation2 + $0x70] sm:$0xff]  ;;  %vm508_vm14 = vcmask 15360  }
  0x19   :  { %v117_v23 = vadd.f32 %v1064_v21, %v1062_v20  ;;  %v1072_v25 = vld [vmem:[#allocation2 + $0x78] sm:$0xff]  ;;  %v1074_v26 = vld [vmem:[#allocation2 + $0x30] sm:$0xff]  ;;  %v1082_v30 = vld [vmem:[#allocation2 + $0xc0] sm:$0xff] }
  0x1a   :  { %109 = vadd.xlane.f32.xlu1 %v108_v10  ;;  %v1076_v27 = vld [vmem:[#allocation2 + $0x38] sm:$0xff]  ;;  %v114_v28 = vadd.f32 %v1072_v25, %v1070_v24  ;;  %v1084_v31 = vld [vmem:[#allocation2 + $0xc8] sm:$0xff]  ;;  %v1086_v32 = vld [vmem:[#allocation2 + $0xa0] sm:$0xff] }
  0x1b   :  { %97 = vadd.xlane.f32.xlu0 %v96_v11  ;;  %v102_v29 = vadd.f32 %v1076_v27, %v1074_v26  ;;  %1440 = vst [vmem:[#allocation8_spill] sm:$0xff] %v1084_v31  ;;  %v1088_v33 = vld [vmem:[#allocation2 + $0xa8] sm:$0xff]  ;;  %v129_v34 = vadd.f32 %v1084_v31, %v1082_v30  ;;  %v1094_v36 = vld [vmem:[#allocation2 + $0xb0] sm:$0xff]  ;;  %v1096_v37 = vld [vmem:[#allocation2 + $0xb8] sm:$0xff] }
  0x1c   :  { %v123_v35 = vadd.f32 %v1088_v33, %v1086_v32  ;;  %1441 = vst [vmem:[#allocation9_spill] sm:$0xff] %v1094_v36  ;;  %1442 = vst [vmem:[#allocation10_spill] sm:$0xff] %v1096_v37  ;;  %v1098_v38 = vld [vmem:[#allocation2 + $0xd0] sm:$0xff]  ;;  %v1100_v39 = vld [vmem:[#allocation2 + $0xd8] sm:$0xff]  ;;  %v126_v40 = vadd.f32 %v1096_v37, %v1094_v36 }
  0x1d   :  { %1443 = vst [vmem:[#allocation11_spill] sm:$0xff] %v1098_v38  ;;  %1444 = vst [vmem:[#allocation12_spill] sm:$0xff] %v1100_v39  ;;  %v132_v41 = vadd.f32 %v1100_v39, %v1098_v38  ;;  %v1106_v42 = vld [vmem:[#allocation2 + $0x100] sm:$0xff]  ;;  %v1108_v43 = vld [vmem:[#allocation2 + $0x108] sm:$0xff] }
  0x1e   :  { %112 = vadd.xlane.f32.xlu1 %v111_v16  ;;  %1445 = vst [vmem:[#allocation13_spill] sm:$0xff] %v1106_v42  ;;  %1446 = vst [vmem:[#allocation14_spill] sm:$0xff] %v1108_v43  ;;  %v1110_v44 = vld [vmem:[#allocation2 + $0xe0] sm:$0xff]  ;;  %v1112_v45 = vld [vmem:[#allocation2 + $0xe8] sm:$0xff]  ;;  %v141_v46 = vadd.f32 %v1108_v43, %v1106_v42 }
  0x1f   :  { %100 = vadd.xlane.f32.xlu0 %v99_v17  ;;  %1447 = vst [vmem:[#allocation15_spill] sm:$0xff] %v1110_v44  ;;  %1448 = vst [vmem:[#allocation16_spill] sm:$0xff] %v1112_v45  ;;  %v135_v47 = vadd.f32 %v1112_v45, %v1110_v44  ;;  %v1118_v48 = vld [vmem:[#allocation2 + $0xf0] sm:$0xff]  ;;  %v1120_v49 = vld [vmem:[#allocation2 + $0xf8] sm:$0xff] }
  0x20   :  { %1449 = vst [vmem:[#allocation17_spill] sm:$0xff] %v1118_v48  ;;  %1450 = vst [vmem:[#allocation18_spill] sm:$0xff] %v1120_v49  ;;  %v1122_v50 = vld [vmem:[#allocation2 + $0x110] sm:$0xff]  ;;  %v1124_v51 = vld [vmem:[#allocation2 + $0x118] sm:$0xff]  ;;  %v138_v52 = vadd.f32 %v1120_v49, %v1118_v48 }
  0x21   :  { %1451 = vst [vmem:[#allocation19_spill] sm:$0xff] %v1122_v50  ;;  %1452 = vst [vmem:[#allocation20_spill] sm:$0xff] %v1124_v51  ;;  %v144_v53 = vadd.f32 %v1124_v51, %v1122_v50  ;;  %v1130_v54 = vld [vmem:[#allocation2 + $0x140] sm:$0xff]  ;;  %v1132_v55 = vld [vmem:[#allocation2 + $0x148] sm:$0xff] }
  0x22   :  { %121 = vadd.xlane.f32.xlu1 %v120_v22  ;;  %1453 = vst [vmem:[#allocation21_spill] sm:$0xff] %v1130_v54  ;;  %1454 = vst [vmem:[#allocation22_spill] sm:$0xff] %v1132_v55  ;;  %v1134_v56 = vld [vmem:[#allocation2 + $0x120] sm:$0xff]  ;;  %v1136_v57 = vld [vmem:[#allocation2 + $0x128] sm:$0xff]  ;;  %v153_v58 = vadd.f32 %v1132_v55, %v1130_v54 }
  0x23   :  { %118 = vadd.xlane.f32.xlu0 %v117_v23  ;;  %1455 = vst [vmem:[#allocation23_spill] sm:$0xff] %v1134_v56  ;;  %1456 = vst [vmem:[#allocation24_spill] sm:$0xff] %v1136_v57  ;;  %v147_v59 = vadd.f32 %v1136_v57, %v1134_v56  ;;  %v1142_v60 = vld [vmem:[#allocation2 + $0x130] sm:$0xff]  ;;  %v1144_v61 = vld [vmem:[#allocation2 + $0x138] sm:$0xff] }
  0x24   :  { %1457 = vst [vmem:[#allocation25_spill] sm:$0xff] %v1142_v60  ;;  %1458 = vst [vmem:[#allocation26_spill] sm:$0xff] %v1144_v61  ;;  %v1146_v62 = vld [vmem:[#allocation2 + $0x150] sm:$0xff]  ;;  %v1148_v63 = vld [vmem:[#allocation2 + $0x158] sm:$0xff]  ;;  %v150_v3 = vadd.f32 %v1144_v61, %v1142_v60 }
  0x25   :  { %1459 = vst [vmem:[#allocation27_spill] sm:$0xff] %v1146_v62  ;;  %1460 = vst [vmem:[#allocation28_spill] sm:$0xff] %v1148_v63  ;;  %v156_v7 = vadd.f32 %v1148_v63, %v1146_v62  ;;  %v1154_v10 = vld [vmem:[#allocation2 + $0x180] sm:$0xff]  ;;  %v1156_v11 = vld [vmem:[#allocation2 + $0x188] sm:$0xff] }
  0x26   :  { %115 = vadd.xlane.f32.xlu1 %v114_v28  ;;  %1461 = vst [vmem:[#allocation29_spill] sm:$0xff] %v1154_v10  ;;  %1462 = vst [vmem:[#allocation30_spill] sm:$0xff] %v1156_v11  ;;  %v1158_v16 = vld [vmem:[#allocation2 + $0x160] sm:$0xff]  ;;  %v1160_v17 = vld [vmem:[#allocation2 + $0x168] sm:$0xff]  ;;  %v165_v22 = vadd.f32 %v1156_v11, %v1154_v10 }
  0x27   :  { %103 = vadd.xlane.f32.xlu0 %v102_v29  ;;  %1463 = vst [vmem:[#allocation31_spill] sm:$0xff] %v1158_v16  ;;  %1464 = vst [vmem:[#allocation32_spill] sm:$0xff] %v1160_v17  ;;  %v159_v23 = vadd.f32 %v1160_v17, %v1158_v16  ;;  %v1166_v28 = vld [vmem:[#allocation2 + $0x170] sm:$0xff]  ;;  %v1168_v29 = vld [vmem:[#allocation2 + $0x178] sm:$0xff] }
  0x28   :  { %1465 = vst [vmem:[#allocation33_spill] sm:$0xff] %v1166_v28  ;;  %1466 = vst [vmem:[#allocation34_spill] sm:$0xff] %v1168_v29 }
  0x2a   :  { %130 = vadd.xlane.f32.xlu1 %v129_v34  ;;  %v1170_v34 = vld [vmem:[#allocation2 + $0x190] sm:$0xff] }
  0x2b   :  { %124 = vadd.xlane.f32.xlu0 %v123_v35  ;;  %1467 = vst [vmem:[#allocation35_spill] sm:$0xff] %v1170_v34  ;;  %v1172_v35 = vld [vmem:[#allocation2 + $0x198] sm:$0xff] }
  0x2c   :  { %1468 = vst [vmem:[#allocation36_spill] sm:$0xff] %v1172_v35 }
  0x2e   :  { %127 = vadd.xlane.f32.xlu1 %v126_v40  ;;  %v162_v40 = vadd.f32 %v1168_v29, %v1166_v28 }
  0x2f   :  { %133 = vadd.xlane.f32.xlu0 %v132_v41  ;;  %v168_v41 = vadd.f32 %v1172_v35, %v1170_v34  ;;  %v1208_v34 = vld [vmem:[#allocation2 + $0x1e8] sm:$0xff] }
  0x30   :  { %1480 = vst [vmem:[#allocation48_spill] sm:$0xff] %v1208_v34 }
  0x32   :  { %142 = vadd.xlane.f32.xlu1 %v141_v46  ;;  %v1178_v46 = vld [vmem:[#allocation2 + $0x1c0] sm:$0xff] }
  0x33   :  { %136 = vadd.xlane.f32.xlu0 %v135_v47  ;;  %1469 = vst [vmem:[#allocation37_spill] sm:$0xff] %v1178_v46  ;;  %v1180_v47 = vld [vmem:[#allocation2 + $0x1c8] sm:$0xff] }
  0x34   :  { %1470 = vst [vmem:[#allocation38_spill] sm:$0xff] %v1180_v47 }
  0x36   :  { %139 = vadd.xlane.f32.xlu1 %v138_v52  ;;  %v1182_v52 = vld [vmem:[#allocation2 + $0x1a0] sm:$0xff] }
  0x37   :  { %145 = vadd.xlane.f32.xlu0 %v144_v53  ;;  %1471 = vst [vmem:[#allocation39_spill] sm:$0xff] %v1182_v52  ;;  %v1184_v53 = vld [vmem:[#allocation2 + $0x1a8] sm:$0xff] }
  0x38   :  { %1472 = vst [vmem:[#allocation40_spill] sm:$0xff] %v1184_v53 }
  0x3a   :  { %154 = vadd.xlane.f32.xlu1 %v153_v58  ;;  %v177_v58 = vadd.f32 %v1180_v47, %v1178_v46  ;;  %v1204_v47 = vld [vmem:[#allocation2 + $0x1f8] sm:$0xff]  ;;  %v1206_v46 = vld [vmem:[#allocation2 + $0x1e0] sm:$0xff] }
  0x3b   :  { %148 = vadd.xlane.f32.xlu0 %v147_v59  ;;  %v171_v59 = vadd.f32 %v1184_v53, %v1182_v52  ;;  %1478 = vst [vmem:[#allocation46_spill] sm:$0xff] %v1204_v47  ;;  %1479 = vst [vmem:[#allocation47_spill] sm:$0xff] %v1206_v46 }
  0x3e   :  { %151 = vadd.xlane.f32.xlu1 %v150_v3  ;;  %v1190_v3 = vld [vmem:[#allocation2 + $0x1b0] sm:$0xff] }
  0x3f   :  { %157 = vadd.xlane.f32.xlu0 %v156_v7  ;;  %1473 = vst [vmem:[#allocation41_spill] sm:$0xff] %v1190_v3  ;;  %v1192_v7 = vld [vmem:[#allocation2 + $0x1b8] sm:$0xff] }
  0x40   :  { %1474 = vst [vmem:[#allocation42_spill] sm:$0xff] %v1192_v7  ;;  %v174_v35 = vadd.f32 %v1192_v7, %v1190_v3  ;;  %v983_v7 = vmov 0.0|0.0  }
  0x41   :  { %915 = vmatprep.subr.bf16.mxu0 %v983_v7 }
  0x42   :  { %166 = vadd.xlane.f32.xlu1 %v165_v22  ;;  %v1194_v22 = vld [vmem:[#allocation2 + $0x1d0] sm:$0xff] }
  0x43   :  { %160 = vadd.xlane.f32.xlu0 %v159_v23  ;;  %1475 = vst [vmem:[#allocation43_spill] sm:$0xff] %v1194_v22  ;;  %v1196_v23 = vld [vmem:[#allocation2 + $0x1d8] sm:$0xff] }
  0x44   :  { %1476 = vst [vmem:[#allocation44_spill] sm:$0xff] %v1196_v23 }
  0x46   :  { %163 = vadd.xlane.f32.xlu1 %v162_v40  ;;  %v180_v40 = vadd.f32 %v1196_v23, %v1194_v22  ;;  %v222_v23 = vld [vmem:[%s1396_s1 + $0x8] sm:$0xff] }
  0x47   :  { %169 = vadd.xlane.f32.xlu0 %v168_v41  ;;  %v1202_v41 = vld [vmem:[#allocation2 + $0x1f0] sm:$0xff] }
  0x48   :  { %1477 = vst [vmem:[#allocation45_spill] sm:$0xff] %v1202_v41  ;;  %v186_v53 = vadd.f32 %v1204_v47, %v1202_v41 }
  0x4a   :  { %178 = vadd.xlane.f32.xlu1 %v177_v58  ;;  %v183_v58 = vadd.f32 %v1208_v34, %v1206_v46 }
  0x4b   :  { %172 = vadd.xlane.f32.xlu0 %v171_v59  ;;  %v221_v59 = vld [vmem:[%s1396_s1] sm:$0xff] }
  0x4c   :  { %v916_v22 = vpack.c.bf16 %v222_v23, %v221_v59 }
  0x4e   :  { %175 = vadd.xlane.f32.xlu1 %v174_v35  ;;  %917 = vmatpush3.bf16.msra.mxu0 %v916_v22  ;;  %v223_v35 = vld [vmem:[%s1396_s1 + $0x10] sm:$0xff] }
  0x4f   :  { %181 = vadd.xlane.f32.xlu0 %v180_v40  ;;  %918 = vmatprep.subr.bf16.mxu0 %v983_v7 }
  0x52   :  { %187 = vadd.xlane.f32.xlu1 %v186_v53  ;;  %v224_v53 = vld [vmem:[%s1396_s1 + $0x18] sm:$0xff] }
  0x53   :  { %184 = vadd.xlane.f32.xlu0 %v183_v58  ;;  %v919_v40 = vpack.c.bf16 %v224_v53, %v223_v35  ;;  %v985_v58 = vmov 0.0   ;;  %v257_v53 = vlaneseq }
  0x54   :  { %907 = vmatprep.mubr.msk.f32.mxu0 %vm984_vm0, %v985_v58  ;;  %910 = vmatprep.subr.mxu1 %v985_v58 }
  0x55   :  { %920 = vmatpush3.bf16.msra.mxu0 %v919_v40  ;;  %912 = vmatprep.mubr.msk.f32.mxu1 %vm984_vm0, %v985_v58  ;;  %v258_v63 = vand.u32 127, %v257_v53  ;;  %v1228_v17 = vshrl.u32 %v257_v53, 7 }
  0x57   :  { %v263_v16 = vadd.s32 4294967288, %v258_v63  ;;  %v270_v61 = vadd.s32 4294967280, %v258_v63  ;;  %v277_v60 = vadd.s32 4294967272, %v258_v63  ;;  %v1233_v51 = vsub.s32 %v258_v63, %v1228_v17 }
  0x59   :  { %v1236_v50 = vsub.s32 %v263_v16, %v1228_v17  ;;  %v1239_v49 = vsub.s32 %v270_v61, %v1228_v17  ;;  %v1242_v53 = vsub.s32 %v277_v60, %v1228_v17 }
  0xa3   :  { %v107_v23 = vpop.xlane.xlu1 %106 }
  0xa4   :  { %v95_v59 = vpop.xlane.xlu0 %94  ;;  %v193_v45 = vmul.f32 0.00390625, %v107_v23 }
  0xa5   :  { %v189_v44 = vmul.f32 0.00390625, %v95_v59 }
  0xa7   :  { %v110_v47 = vpop.xlane.xlu1 %109 }
  0xa8   :  { %v98_v22 = vpop.xlane.xlu0 %97  ;;  %v194_v57 = vmul.f32 0.00390625, %v110_v47 }
  0xa9   :  { %v190_v56 = vmul.f32 0.00390625, %v98_v22 }
  0xaa   :  { %v291_v47 = vrot.slane %v194_v57, %v1236_v50 }
  0xab   :  { %v113_v7 = vpop.xlane.xlu1 %112  ;;  %v267_v61 = vrot.slane %v190_v56, %v1236_v50 }
  0xac   :  { %v101_v41 = vpop.xlane.xlu0 %100  ;;  %v195_v48 = vmul.f32 0.00390625, %v113_v7 }
  0xad   :  { %v191_v43 = vmul.f32 0.00390625, %v101_v41 }
  0xae   :  { %v296_v60 = vrot.slane %v195_v48, %v1239_v49 }
  0xaf   :  { %v122_v34 = vpop.xlane.xlu1 %121  ;;  %v274_v41 = vrot.slane %v191_v43, %v1239_v49 }
  0xb0   :  { %v119_v46 = vpop.xlane.xlu0 %118  ;;  %v198_v42 = vmul.f32 0.00390625, %v122_v34 }
  0xb1   :  { %v197_v39 = vmul.f32 0.00390625, %v119_v46 }
  0xb2   :  { %v310_v34 = vrot.slane %v198_v42, %v1236_v50 }
  0xb3   :  { %v116_v3 = vpop.xlane.xlu1 %115  ;;  %v306_v46 = vrot.slane %v197_v39, %v1233_v51 }
  0xb4   :  { %v104_v52 = vpop.xlane.xlu0 %103  ;;  %v196_v63 = vmul.f32 0.00390625, %v116_v3  ;;  %v262_v3 = vrot.slane %v189_v44, %v1233_v51 }
  0xb5   :  { %v192_v37 = vmul.f32 0.00390625, %v104_v52  ;;  %v287_v52 = vrot.slane %v193_v45, %v1233_v51  ;;  %v311_v44 = vsel %vm268_vm1, %v310_v34, %v306_v46 }
  0xb6   :  { %v269_v43 = vsel %vm268_vm1, %v267_v61, %v262_v3 }
  0xb7   :  { %v131_v29 = vpop.xlane.xlu1 %130  ;;  %v281_v57 = vrot.slane %v192_v37, %v1242_v53  ;;  %v292_v48 = vsel %vm268_vm1, %v291_v47, %v287_v52  ;;  %v276_v45 = vsel %vm275_vm2, %v274_v41, %v269_v43 }
  0xb8   :  { %v125_v28 = vpop.xlane.xlu0 %124  ;;  %v297_v59 = vsel %vm275_vm2, %v296_v60, %v292_v48 }
  0xb9   :  { %v199_v16 = vmul.f32 0.00390625, %v125_v28  ;;  %v301_v28 = vrot.slane %v196_v63, %v1242_v53  ;;  %v283_v63 = vsel %vm282_vm3, %v281_v57, %v276_v45 }
  0xbb   :  { %v128_v11 = vpop.xlane.xlu1 %127  ;;  %v302_v37 = vsel %vm282_vm3, %v301_v28, %v297_v59 }
  0xbc   :  { %v134_v35 = vpop.xlane.xlu0 %133  ;;  %v200_v22 = vmul.f32 0.00390625, %v128_v11  ;;  %v315_v11 = vrot.slane %v199_v16, %v1239_v49  ;;  %v201_v16 = vmul.f32 0.00390625, %v131_v29  ;;  %v418_v60 = vsel %vm417_vm4, %v302_v37, %v283_v63 }
  0xbd   :  { %v202_v39 = vmul.f32 0.00390625, %v134_v35 }
  0xbe   :  { %v320_v42 = vrot.slane %v200_v22, %v1242_v53  ;;  %v316_v61 = vsel %vm275_vm2, %v315_v11, %v311_v44  ;;  %v325_v3 = vrot.slane %v201_v16, %v1233_v51 }
  0xbf   :  { %v1226_v40 = vpop.xlane.xlu1 %142  ;;  %v329_v22 = vrot.slane %v202_v39, %v1236_v50 }
  0xc0   :  { %v137_v10 = vpop.xlane.xlu0 %136  ;;  %v321_v35 = vsel %vm282_vm3, %v320_v42, %v316_v61  ;;  %v205_v41 = vmul.f32 0.00390625, %v1226_v40 }
  0xc1   :  { %v203_v31 = vmul.f32 0.00390625, %v137_v10  ;;  %v420_v11 = vsel %vm419_vm5, %v321_v35, %v418_v60  ;;  %v330_v39 = vsel %vm268_vm1, %v329_v22, %v325_v3 }
  0xc2   :  { %v344_v59 = vrot.slane %v205_v41, %v1233_v51 }
  0xc3   :  { %v140_v58 = vpop.xlane.xlu1 %139  ;;  %v334_v28 = vrot.slane %v203_v31, %v1239_v49 }
  0xc4   :  { %v146_v62 = vpop.xlane.xlu0 %145  ;;  %v204_v34 = vmul.f32 0.00390625, %v140_v58 }
  0xc5   :  { %v206_v46 = vmul.f32 0.00390625, %v146_v62  ;;  %v335_v44 = vsel %vm275_vm2, %v334_v28, %v330_v39 }
  0xc6   :  { %v339_v31 = vrot.slane %v204_v34, %v1242_v53 }
  0xc7   :  { %v1230_v55 = vpop.xlane.xlu1 %154 }
  0xc8   :  { %v149_v54 = vpop.xlane.xlu0 %148  ;;  %v209_v40 = vmul.f32 0.00390625, %v1230_v55  ;;  %v340_v60 = vsel %vm282_vm3, %v339_v31, %v335_v44 }
  0xc9   :  { %v207_v10 = vmul.f32 0.00390625, %v149_v54  ;;  %v348_v54 = vrot.slane %v206_v46, %v1236_v50  ;;  %v422_v31 = vsel %vm421_vm6, %v340_v60, %v420_v11 }
  0xca   :  { %v363_v61 = vrot.slane %v209_v40, %v1233_v51 }
  0xcb   :  { %v152_v38 = vpop.xlane.xlu1 %151  ;;  %v349_v41 = vsel %vm268_vm1, %v348_v54, %v344_v59 }
  0xcc   :  { %v158_v36 = vpop.xlane.xlu0 %157  ;;  %v208_v48 = vmul.f32 0.00390625, %v152_v38  ;;  %v353_v38 = vrot.slane %v207_v10, %v1239_v49 }
  0xcd   :  { %v210_v29 = vmul.f32 0.00390625, %v158_v36 }
  0xce   :  { %v358_v55 = vrot.slane %v208_v48, %v1242_v53  ;;  %v354_v28 = vsel %vm275_vm2, %v353_v38, %v349_v41 }
  0xcf   :  { %v167_v23 = vpop.xlane.xlu1 %166 }
  0xd0   :  { %v161_v56 = vpop.xlane.xlu0 %160  ;;  %v213_v36 = vmul.f32 0.00390625, %v167_v23 }
  0xd1   :  { %v211_v43 = vmul.f32 0.00390625, %v161_v56  ;;  %v367_v56 = vrot.slane %v210_v29, %v1236_v50 }
  0xd2   :  { %v382_v34 = vrot.slane %v213_v36, %v1233_v51 }
  0xd3   :  { %v164_v7 = vpop.xlane.xlu1 %163  ;;  %v368_v10 = vsel %vm268_vm1, %v367_v56, %v363_v61 }
  0xd4   :  { %v170_v47 = vpop.xlane.xlu0 %169  ;;  %v212_v58 = vmul.f32 0.00390625, %v164_v7  ;;  %v372_v7 = vrot.slane %v211_v43, %v1239_v49 }
  0xd5   :  { %v214_v42 = vmul.f32 0.00390625, %v170_v47 }
  0xd6   :  { %v377_v23 = vrot.slane %v212_v58, %v1242_v53  ;;  %v373_v43 = vsel %vm275_vm2, %v372_v7, %v368_v10  ;;  %v651_v10 = vsub.s32 3, %v1228_v17 }
  0xd7   :  { %v179_v52 = vpop.xlane.xlu1 %178  ;;  %v386_v16 = vrot.slane %v214_v42, %v1236_v50 }
  0xd8   :  { %v173_v57 = vpop.xlane.xlu0 %172  ;;  %v217_v35 = vmul.f32 0.00390625, %v179_v52  ;;  %v359_v52 = vsel %vm282_vm3, %v358_v55, %v354_v28  ;;  %v378_v40 = vsel %vm282_vm3, %v377_v23, %v373_v43 }
  0xd9   :  { %v215_v62 = vmul.f32 0.00390625, %v173_v57  ;;  %v387_v42 = vsel %vm268_vm1, %v386_v16, %v382_v34  ;;  %v424_v36 = vsel %vm423_vm7, %v359_v52, %v422_v31  ;;  %v613_v34 = vsub.s32 1, %v1228_v17 }
  0xda   :  { %v401_v58 = vrot.slane %v217_v35, %v1233_v51  ;;  %v426_v51 = vsel %vm425_vm8, %v378_v40, %v424_v36  ;;  %v689_v52 = vsub.s32 5, %v1228_v17  ;;  %v727_v40 = vsub.s32 7, %v1228_v17 }
  0xdb   :  { %v176_v45 = vpop.xlane.xlu1 %175  ;;  %v391_v22 = vrot.slane %v215_v62, %v1239_v49 }
  0xdc   :  { %v216_v37 = vmul.f32 0.00390625, %v176_v45  ;;  %v182_v63 = vpop.xlane.xlu0 %181 }
  0xdd   :  { %v218_v47 = vmul.f32 0.00390625, %v182_v63  ;;  %v392_v62 = vsel %vm275_vm2, %v391_v22, %v387_v42  ;;  %v594_v22 = vsub.s32 0, %v1228_v17  ;;  %v708_v42 = vsub.s32 6, %v1228_v17 }
  0xde   :  { %v396_v46 = vrot.slane %v216_v37, %v1242_v53 }
  0xdf   :  { %v188_v3 = vpop.xlane.xlu1 %187  ;;  %v405_v29 = vrot.slane %v218_v47, %v1236_v50 }
  0xe0   :  { %v185_v57 = vpop.xlane.xlu0 %184  ;;  %v220_v48 = vmul.f32 0.00390625, %v188_v3  ;;  %v397_v50 = vsel %vm282_vm3, %v396_v46, %v392_v62  ;;  %v632_v3 = vsub.s32 2, %v1228_v17 }
  0xe1   :  { %v219_v39 = vmul.f32 0.00390625, %v185_v57  ;;  %v406_v45 = vsel %vm268_vm1, %v405_v29, %v401_v58  ;;  %v670_v57 = vsub.s32 4, %v1228_v17 }
  0xe2   :  { %v415_v59 = vrot.slane %v220_v48, %v1242_v53  ;;  %v428_v53 = vsel %vm427_vm9, %v397_v50, %v426_v51 }
  0xe3   :  { %v410_v54 = vrot.slane %v219_v39, %v1239_v49  ;;  %v507_v49 = vld [vmem:[%s1397_s2] sm:$0x3]  ;;  %s986_s2 = smov [#allocation5]  }
  0xe4   :  { %911 = vmatpush3.msk.msra.mxu1 %vm512_vm12, %v507_v49  ;;  %s877_s7 = sshll.u32 %s986_s2, 4  ;;  %s878_s7 = int_to_ptr.vmem [resolvable:$true] %s877_s7 }
  0xe5   :  { %v411_v44 = vsel %vm275_vm2, %v410_v54, %v406_v45  ;;  %s954_s8 = scalar_lea.vmem %s878_s7, 8192  ;;  %p959_p9 = scmp.lt.s32.totalorder %s878_s7, %s878_s7 }
  0xe6   :  { %v416_v38 = vsel %vm282_vm3, %v415_v59, %v411_v44  ;;  %p955_p8 = scmp.ne.s32.totalorder %s878_s7, %s954_s8  ;;  %p960_p10 = scmp.lt.s32.totalorder %s954_s8, %s954_s8 }
  0xe7   :  { %v430_v56 = vsel %vm429_vm10, %v416_v38, %v428_v53 }
  0xe8   :  { %908 = vmatmul.mubr.msk.f32.vlgmr.msra.gmra.mrb[0].mxu0 %vm431_vm11, %v430_v56  ;;  %p961_p11 = por %p960_p10, %p959_p9 }
  0xea   :  { %p962_p12 = pnand %p961_p11, %p955_p8 }
 0x1bb   :  { %v500_v11 = vpop.f32.mrb[0].mxu0 }
 0x1bc   :  { %vm504_vm13 = vcmp.gt.f32.partialorder %v500_v11, 0.0  ;;  %v505_v37 = vmul.f32 0.2, %v500_v11  ;;  %v909_v63 = vpop.f32.mrb[1].mxu0 }
 0x1be   :  { %v506_v55 = vsel %vm504_vm13, %v500_v11, %v505_v37 }
 0x1bf   :  { %913 = vmatmul.mubr.msk.f32.vlgmr.msra.gmra.mrb[0].mxu1 %vm508_vm14, %v506_v55 }
 0x292   :  { %v582_v7 = vpop.f32.mrb[0].mxu1 }
 0x293   :  { %v586_v16 = vsub.f32 0.0, %v582_v7  ;;  %v914_v47 = vpop.f32.mrb[1].mxu1 }
 0x295   :  { %v587_v61 = vmul.f32 1.442695, %v586_v16  ;;  %v1481_v16 = vld [vmem:[#allocation8_spill] sm:$0xff] }
 0x297   :  { %928 = vpow2.f32 %v587_v61  ;;  %v1483_v61 = vld [vmem:[#allocation10_spill] sm:$0xff] }
 0x2a1   :  { %v929_v23 = vpop.eup %928 }
 0x2a2   :  { %v589_v35 = vadd.f32 1.0, %v929_v23 }
 0x2a4   :  { %930 = vrcp.f32 %v589_v35  ;;  %v1484_v35 = vld [vmem:[#allocation15_spill] sm:$0xff] }
 0x2ae   :  { %v931_v60 = vpop.eup %930 }
 0x2af   :  { %v595_v41 = vrot.slane %v931_v60, %v594_v22  ;;  %v614_v46 = vrot.slane %v931_v60, %v613_v34  ;;  %v633_v28 = vrot.slane %v931_v60, %v632_v3  ;;  %v652_v29 = vrot.slane %v931_v60, %v651_v10 }
 0x2b0   :  { %v671_v48 = vrot.slane %v931_v60, %v670_v57  ;;  %v690_v43 = vrot.slane %v931_v60, %v689_v52  ;;  %v709_v39 = vrot.slane %v931_v60, %v708_v42  ;;  %v728_v58 = vrot.slane %v931_v60, %v727_v40  ;;  %v1485_v60 = vld [vmem:[#allocation16_spill] sm:$0xff] }
 0x2b1   :  { %601 = vbcast.lane.b32.xlu1 %v595_v41, 264  ;;  %597 = vbcast.lane.b32.xlu0 %v595_v41, 256 }
 0x2b5   :  { %605 = vbcast.lane.b32.xlu1 %v595_v41, 272  ;;  %616 = vbcast.lane.b32.xlu0 %v614_v46, 256 }
 0x2b9   :  { %609 = vbcast.lane.b32.xlu1 %v595_v41, 280  ;;  %624 = vbcast.lane.b32.xlu0 %v614_v46, 272  ;;  %v1486_v41 = vld [vmem:[#allocation11_spill] sm:$0xff] }
 0x2bd   :  { %620 = vbcast.lane.b32.xlu1 %v614_v46, 264  ;;  %635 = vbcast.lane.b32.xlu0 %v633_v28, 256 }
 0x2c1   :  { %628 = vbcast.lane.b32.xlu1 %v614_v46, 280  ;;  %643 = vbcast.lane.b32.xlu0 %v633_v28, 272  ;;  %v1487_v46 = vld [vmem:[#allocation12_spill] sm:$0xff] }
 0x2c5   :  { %639 = vbcast.lane.b32.xlu1 %v633_v28, 264  ;;  %654 = vbcast.lane.b32.xlu0 %v652_v29, 256 }
 0x2c9   :  { %647 = vbcast.lane.b32.xlu1 %v633_v28, 280  ;;  %662 = vbcast.lane.b32.xlu0 %v652_v29, 272  ;;  %v1488_v28 = vld [vmem:[#allocation13_spill] sm:$0xff] }
 0x2cd   :  { %658 = vbcast.lane.b32.xlu1 %v652_v29, 264  ;;  %673 = vbcast.lane.b32.xlu0 %v671_v48, 256 }
 0x2d1   :  { %666 = vbcast.lane.b32.xlu1 %v652_v29, 280  ;;  %681 = vbcast.lane.b32.xlu0 %v671_v48, 272  ;;  %v1489_v29 = vld [vmem:[#allocation14_spill] sm:$0xff] }
 0x2d5   :  { %677 = vbcast.lane.b32.xlu1 %v671_v48, 264  ;;  %692 = vbcast.lane.b32.xlu0 %v690_v43, 256 }
 0x2d9   :  { %685 = vbcast.lane.b32.xlu1 %v671_v48, 280  ;;  %700 = vbcast.lane.b32.xlu0 %v690_v43, 272 }
 0x2dd   :  { %696 = vbcast.lane.b32.xlu1 %v690_v43, 264  ;;  %711 = vbcast.lane.b32.xlu0 %v709_v39, 256 }
 0x2e1   :  { %704 = vbcast.lane.b32.xlu1 %v690_v43, 280  ;;  %719 = vbcast.lane.b32.xlu0 %v709_v39, 272  ;;  %v1490_v43 = vld [vmem:[#allocation17_spill] sm:$0xff] }
 0x2e5   :  { %715 = vbcast.lane.b32.xlu1 %v709_v39, 264  ;;  %730 = vbcast.lane.b32.xlu0 %v728_v58, 256 }
 0x2e9   :  { %723 = vbcast.lane.b32.xlu1 %v709_v39, 280  ;;  %738 = vbcast.lane.b32.xlu0 %v728_v58, 272  ;;  %v1491_v39 = vld [vmem:[#allocation18_spill] sm:$0xff] }
 0x2ed   :  { %734 = vbcast.lane.b32.xlu1 %v728_v58, 264 }
 0x2f1   :  { %742 = vbcast.lane.b32.xlu1 %v728_v58, 280  ;;  %v1492_v58 = vld [vmem:[#allocation23_spill] sm:$0xff] }
 0x323   :  { %v602_v62 = vpop.permute.xlu1 %601  ;;  %v598_v59 = vpop.permute.xlu0 %597 }
 0x324   :  { %v746_v31 = vmul.f32 %v602_v62, %v1038_v8  ;;  %v747_v50 = vmul.f32 %v602_v62, %v1040_v9  ;;  %v744_v54 = vmul.f32 %v598_v59, %v1026_v2  ;;  %v745_v36 = vmul.f32 %v598_v59, %v1030_v4  ;;  %v1493_v59 = vld [vmem:[#allocation24_spill] sm:$0xff] }
 0x326   :  { %810 = vst [vmem:[#allocation5 + $0x10] sm:$0xff] %v746_v31  ;;  %811 = vst [vmem:[#allocation5 + $0x18] sm:$0xff] %v747_v50 }
 0x327   :  { %808 = vst [vmem:[#allocation5] sm:$0xff] %v744_v54  ;;  %809 = vst [vmem:[#allocation5 + $0x8] sm:$0xff] %v745_v36  ;;  %v606_v17 = vpop.permute.xlu1 %605  ;;  %v617_v45 = vpop.permute.xlu0 %616  ;;  %v1494_v36 = vld [vmem:[#allocation19_spill] sm:$0xff] }
 0x328   :  { %v748_v44 = vmul.f32 %v606_v17, %v1050_v14  ;;  %v749_v51 = vmul.f32 %v606_v17, %v1052_v15  ;;  %v752_v38 = vmul.f32 %v617_v45, %v1022_v0  ;;  %v753_v8 = vmul.f32 %v617_v45, %v1024_v1  ;;  %v1495_v45 = vld [vmem:[#allocation20_spill] sm:$0xff] }
 0x32a   :  { %812 = vst [vmem:[#allocation5 + $0x20] sm:$0xff] %v748_v44  ;;  %813 = vst [vmem:[#allocation5 + $0x28] sm:$0xff] %v749_v51  ;;  %v1496_v51 = vld [vmem:[#allocation21_spill] sm:$0xff] }
 0x32b   :  { %816 = vst [vmem:[#allocation5 + $0x40] sm:$0xff] %v752_v38  ;;  %817 = vst [vmem:[#allocation5 + $0x48] sm:$0xff] %v753_v8  ;;  %v610_v2 = vpop.permute.xlu1 %609  ;;  %v625_v4 = vpop.permute.xlu0 %624  ;;  %v1497_v8 = vld [vmem:[#allocation22_spill] sm:$0xff] }
 0x32c   :  { %v750_v9 = vmul.f32 %v610_v2, %v1074_v26  ;;  %v751_v53 = vmul.f32 %v610_v2, %v1076_v27  ;;  %v756_v56 = vmul.f32 %v625_v4, %v1046_v12  ;;  %v757_v14 = vmul.f32 %v625_v4, %v1048_v13 }
 0x32e   :  { %814 = vst [vmem:[#allocation5 + $0x30] sm:$0xff] %v750_v9  ;;  %815 = vst [vmem:[#allocation5 + $0x38] sm:$0xff] %v751_v53  ;;  %v1498_v53 = vld [vmem:[#allocation25_spill] sm:$0xff] }
 0x32f   :  { %820 = vst [vmem:[#allocation5 + $0x60] sm:$0xff] %v756_v56  ;;  %821 = vst [vmem:[#allocation5 + $0x68] sm:$0xff] %v757_v14  ;;  %v621_v0 = vpop.permute.xlu1 %620  ;;  %v636_v1 = vpop.permute.xlu0 %635  ;;  %v1499_v14 = vld [vmem:[#allocation26_spill] sm:$0xff] }
 0x330   :  { %v754_v15 = vmul.f32 %v621_v0, %v1032_v5  ;;  %v755_v49 = vmul.f32 %v621_v0, %v1034_v6  ;;  %v760_v11 = vmul.f32 %v636_v1, %v1062_v20  ;;  %v761_v26 = vmul.f32 %v636_v1, %v1064_v21  ;;  %v1500_v1 = vld [vmem:[#allocation31_spill] sm:$0xff] }
 0x332   :  { %818 = vst [vmem:[#allocation5 + $0x50] sm:$0xff] %v754_v15  ;;  %819 = vst [vmem:[#allocation5 + $0x58] sm:$0xff] %v755_v49  ;;  %v1501_v49 = vld [vmem:[#allocation32_spill] sm:$0xff] }
 0x333   :  { %824 = vst [vmem:[#allocation5 + $0x80] sm:$0xff] %v760_v11  ;;  %825 = vst [vmem:[#allocation5 + $0x88] sm:$0xff] %v761_v26  ;;  %v629_v12 = vpop.permute.xlu1 %628  ;;  %v644_v13 = vpop.permute.xlu0 %643 }
 0x334   :  { %v758_v27 = vmul.f32 %v629_v12, %v1070_v24  ;;  %v759_v37 = vmul.f32 %v629_v12, %v1072_v25  ;;  %v764_v63 = vmul.f32 %v644_v13, %v1086_v32  ;;  %v765_v5 = vmul.f32 %v644_v13, %v1088_v33  ;;  %v1482_v33 = vld [vmem:[#allocation9_spill] sm:$0xff]  ;;  %v1502_v13 = vld [vmem:[#allocation27_spill] sm:$0xff] }
 0x336   :  { %822 = vst [vmem:[#allocation5 + $0x70] sm:$0xff] %v758_v27  ;;  %823 = vst [vmem:[#allocation5 + $0x78] sm:$0xff] %v759_v37  ;;  %v1503_v37 = vld [vmem:[#allocation28_spill] sm:$0xff] }
 0x337   :  { %828 = vst [vmem:[#allocation5 + $0xa0] sm:$0xff] %v764_v63  ;;  %829 = vst [vmem:[#allocation5 + $0xa8] sm:$0xff] %v765_v5  ;;  %v640_v6 = vpop.permute.xlu1 %639  ;;  %v655_v20 = vpop.permute.xlu0 %654  ;;  %v1504_v5 = vld [vmem:[#allocation29_spill] sm:$0xff] }
 0x338   :  { %v762_v21 = vmul.f32 %v640_v6, %v1058_v18  ;;  %v763_v55 = vmul.f32 %v640_v6, %v1060_v19  ;;  %v768_v7 = vmul.f32 %v655_v20, %v1082_v30  ;;  %v769_v24 = vmul.f32 %v655_v20, %v1481_v16  ;;  %v1505_v20 = vld [vmem:[#allocation30_spill] sm:$0xff]  ;;  %v1506_v16 = vld [vmem:[#allocation33_spill] sm:$0xff] }
 0x33a   :  { %826 = vst [vmem:[#allocation5 + $0x90] sm:$0xff] %v762_v21  ;;  %827 = vst [vmem:[#allocation5 + $0x98] sm:$0xff] %v763_v55 }
 0x33b   :  { %832 = vst [vmem:[#allocation5 + $0xc0] sm:$0xff] %v768_v7  ;;  %833 = vst [vmem:[#allocation5 + $0xc8] sm:$0xff] %v769_v24  ;;  %v648_v25 = vpop.permute.xlu1 %647  ;;  %v663_v32 = vpop.permute.xlu0 %662 }
 0x33c   :  { %v766_v47 = vmul.f32 %v648_v25, %v1482_v33  ;;  %v767_v23 = vmul.f32 %v648_v25, %v1483_v61  ;;  %v772_v22 = vmul.f32 %v663_v32, %v1484_v35  ;;  %v773_v18 = vmul.f32 %v663_v32, %v1485_v60  ;;  %v1507_v25 = vld [vmem:[#allocation34_spill] sm:$0xff]  ;;  %v1508_v33 = vld [vmem:[#allocation39_spill] sm:$0xff]  ;;  %v1509_v61 = vld [vmem:[#allocation40_spill] sm:$0xff] }
 0x33d   :  { %v1510_v60 = vld [vmem:[#allocation35_spill] sm:$0xff] }
 0x33e   :  { %830 = vst [vmem:[#allocation5 + $0xb0] sm:$0xff] %v766_v47  ;;  %831 = vst [vmem:[#allocation5 + $0xb8] sm:$0xff] %v767_v23 }
 0x33f   :  { %836 = vst [vmem:[#allocation5 + $0xe0] sm:$0xff] %v772_v22  ;;  %837 = vst [vmem:[#allocation5 + $0xe8] sm:$0xff] %v773_v18  ;;  %v659_v19 = vpop.permute.xlu1 %658  ;;  %v674_v30 = vpop.permute.xlu0 %673 }
 0x340   :  { %v770_v34 = vmul.f32 %v659_v19, %v1486_v41  ;;  %v771_v3 = vmul.f32 %v659_v19, %v1487_v46  ;;  %v776_v10 = vmul.f32 %v674_v30, %v1488_v28  ;;  %v777_v57 = vmul.f32 %v674_v30, %v1489_v29  ;;  %v1511_v19 = vld [vmem:[#allocation36_spill] sm:$0xff]  ;;  %v1512_v41 = vld [vmem:[#allocation37_spill] sm:$0xff]  ;;  %v1513_v46 = vld [vmem:[#allocation38_spill] sm:$0xff] }
 0x341   :  { %v1514_v29 = vld [vmem:[#allocation41_spill] sm:$0xff] }
 0x342   :  { %834 = vst [vmem:[#allocation5 + $0xd0] sm:$0xff] %v770_v34  ;;  %835 = vst [vmem:[#allocation5 + $0xd8] sm:$0xff] %v771_v3 }
 0x343   :  { %840 = vst [vmem:[#allocation5 + $0x100] sm:$0xff] %v776_v10  ;;  %841 = vst [vmem:[#allocation5 + $0x108] sm:$0xff] %v777_v57  ;;  %v667_v48 = vpop.permute.xlu1 %666  ;;  %v682_v52 = vpop.permute.xlu0 %681 }
 0x344   :  { %v774_v42 = vmul.f32 %v667_v48, %v1490_v43  ;;  %v775_v40 = vmul.f32 %v667_v48, %v1491_v39  ;;  %v780_v62 = vmul.f32 %v682_v52, %v1492_v58  ;;  %v781_v31 = vmul.f32 %v682_v52, %v1493_v59  ;;  %v1515_v48 = vld [vmem:[#allocation42_spill] sm:$0xff]  ;;  %v1516_v43 = vld [vmem:[#allocation47_spill] sm:$0xff]  ;;  %v1517_v39 = vld [vmem:[#allocation48_spill] sm:$0xff] }
 0x346   :  { %838 = vst [vmem:[#allocation5 + $0xf0] sm:$0xff] %v774_v42  ;;  %839 = vst [vmem:[#allocation5 + $0xf8] sm:$0xff] %v775_v40 }
 0x347   :  { %844 = vst [vmem:[#allocation5 + $0x120] sm:$0xff] %v780_v62  ;;  %845 = vst [vmem:[#allocation5 + $0x128] sm:$0xff] %v781_v31  ;;  %v678_v50 = vpop.permute.xlu1 %677  ;;  %v693_v54 = vpop.permute.xlu0 %692  ;;  %v1518_v62 = vld [vmem:[#allocation43_spill] sm:$0xff]  ;;  %v1519_v31 = vld [vmem:[#allocation44_spill] sm:$0xff] }
 0x348   :  { %v778_v17 = vmul.f32 %v678_v50, %v1494_v36  ;;  %v779_v44 = vmul.f32 %v678_v50, %v1495_v45  ;;  %v784_v38 = vmul.f32 %v693_v54, %v1496_v51  ;;  %v785_v2 = vmul.f32 %v693_v54, %v1497_v8  ;;  %v1520_v36 = vld [vmem:[#allocation45_spill] sm:$0xff]  ;;  %v1521_v45 = vld [vmem:[#allocation46_spill] sm:$0xff] }
 0x34a   :  { %842 = vst [vmem:[#allocation5 + $0x110] sm:$0xff] %v778_v17  ;;  %843 = vst [vmem:[#allocation5 + $0x118] sm:$0xff] %v779_v44 }
 0x34b   :  { %848 = vst [vmem:[#allocation5 + $0x140] sm:$0xff] %v784_v38  ;;  %849 = vst [vmem:[#allocation5 + $0x148] sm:$0xff] %v785_v2  ;;  %v686_v4 = vpop.permute.xlu1 %685  ;;  %v701_v9 = vpop.permute.xlu0 %700 }
 0x34c   :  { %v782_v56 = vmul.f32 %v686_v4, %v1498_v53  ;;  %v783_v0 = vmul.f32 %v686_v4, %v1499_v14  ;;  %v788_v15 = vmul.f32 %v701_v9, %v1500_v1  ;;  %v789_v11 = vmul.f32 %v701_v9, %v1501_v49 }
 0x34e   :  { %846 = vst [vmem:[#allocation5 + $0x130] sm:$0xff] %v782_v56  ;;  %847 = vst [vmem:[#allocation5 + $0x138] sm:$0xff] %v783_v0 }
 0x34f   :  { %852 = vst [vmem:[#allocation5 + $0x160] sm:$0xff] %v788_v15  ;;  %853 = vst [vmem:[#allocation5 + $0x168] sm:$0xff] %v789_v11  ;;  %v697_v26 = vpop.permute.xlu1 %696  ;;  %v712_v12 = vpop.permute.xlu0 %711 }
 0x350   :  { %v786_v27 = vmul.f32 %v697_v26, %v1502_v13  ;;  %v787_v63 = vmul.f32 %v697_v26, %v1503_v37  ;;  %v792_v6 = vmul.f32 %v712_v12, %v1504_v5  ;;  %v793_v21 = vmul.f32 %v712_v12, %v1505_v20 }
 0x352   :  { %850 = vst [vmem:[#allocation5 + $0x150] sm:$0xff] %v786_v27  ;;  %851 = vst [vmem:[#allocation5 + $0x158] sm:$0xff] %v787_v63 }
 0x353   :  { %856 = vst [vmem:[#allocation5 + $0x180] sm:$0xff] %v792_v6  ;;  %857 = vst [vmem:[#allocation5 + $0x188] sm:$0xff] %v793_v21  ;;  %v705_v55 = vpop.permute.xlu1 %704  ;;  %v720_v7 = vpop.permute.xlu0 %719 }
 0x354   :  { %v790_v24 = vmul.f32 %v705_v55, %v1506_v16  ;;  %v791_v32 = vmul.f32 %v705_v55, %v1507_v25  ;;  %v796_v47 = vmul.f32 %v720_v7, %v1508_v33  ;;  %v797_v23 = vmul.f32 %v720_v7, %v1509_v61 }
 0x356   :  { %854 = vst [vmem:[#allocation5 + $0x170] sm:$0xff] %v790_v24  ;;  %855 = vst [vmem:[#allocation5 + $0x178] sm:$0xff] %v791_v32 }
 0x357   :  { %860 = vst [vmem:[#allocation5 + $0x1a0] sm:$0xff] %v796_v47  ;;  %861 = vst [vmem:[#allocation5 + $0x1a8] sm:$0xff] %v797_v23  ;;  %v716_v35 = vpop.permute.xlu1 %715  ;;  %v731_v22 = vpop.permute.xlu0 %730 }
 0x358   :  { %v794_v18 = vmul.f32 %v716_v35, %v1510_v60  ;;  %v795_v30 = vmul.f32 %v716_v35, %v1511_v19  ;;  %v800_v34 = vmul.f32 %v731_v22, %v1512_v41  ;;  %v801_v3 = vmul.f32 %v731_v22, %v1513_v46 }
 0x35a   :  { %858 = vst [vmem:[#allocation5 + $0x190] sm:$0xff] %v794_v18  ;;  %859 = vst [vmem:[#allocation5 + $0x198] sm:$0xff] %v795_v30 }
 0x35b   :  { %864 = vst [vmem:[#allocation5 + $0x1c0] sm:$0xff] %v800_v34  ;;  %865 = vst [vmem:[#allocation5 + $0x1c8] sm:$0xff] %v801_v3  ;;  %v724_v28 = vpop.permute.xlu1 %723  ;;  %v739_v10 = vpop.permute.xlu0 %738 }
 0x35c   :  { %v798_v57 = vmul.f32 %v724_v28, %v1514_v29  ;;  %v799_v52 = vmul.f32 %v724_v28, %v1515_v48  ;;  %v804_v42 = vmul.f32 %v739_v10, %v1516_v43  ;;  %v805_v40 = vmul.f32 %v739_v10, %v1517_v39 }
 0x35e   :  { %862 = vst [vmem:[#allocation5 + $0x1b0] sm:$0xff] %v798_v57  ;;  %863 = vst [vmem:[#allocation5 + $0x1b8] sm:$0xff] %v799_v52 }
 0x35f   :  { %868 = vst [vmem:[#allocation5 + $0x1e0] sm:$0xff] %v804_v42  ;;  %869 = vst [vmem:[#allocation5 + $0x1e8] sm:$0xff] %v805_v40  ;;  %v735_v58 = vpop.permute.xlu1 %734 }
 0x360   :  { %v802_v59 = vmul.f32 %v735_v58, %v1518_v62  ;;  %v803_v50 = vmul.f32 %v735_v58, %v1519_v31 }
 0x362   :  { %866 = vst [vmem:[#allocation5 + $0x1d0] sm:$0xff] %v802_v59  ;;  %867 = vst [vmem:[#allocation5 + $0x1d8] sm:$0xff] %v803_v50 }
 0x363   :  { %v743_v54 = vpop.permute.xlu1 %742 }
 0x364   :  { %v806_v17 = vmul.f32 %v743_v54, %v1520_v36  ;;  %v807_v44 = vmul.f32 %v743_v54, %v1521_v45 }
 0x366   :  { %870 = vst [vmem:[#allocation5 + $0x1f0] sm:$0xff] %v806_v17  ;;  %871 = vst [vmem:[#allocation5 + $0x1f8] sm:$0xff] %v807_v44 }
 0x367   :  { %965 = shalt.err (!%p962_p12)
}
 0x368   :  { %s966_s11 = scalar_lea.hbm %s1398_s3, 8192 }
 0x369   :  { %p967_p13 = scmp.ne.s32.totalorder %s1398_s3, %s966_s11  ;;  %p970_p0 = scmp.lt.u32.totalorder %s966_s11, %s1398_s3 }
 0x36b   :  { %p972_p1 = pnand %p970_p0, %p967_p13 }
 0x36d   :  { %975 = shalt.err (!%p972_p1)
}
 0x36e   :  { %883 = dma.vmem_to_hbm [thread:$0]  %s878_s7, 8192, %s1398_s3, [#allocation4], %s981_s22, %s981_s22, %s982_s23  }
 0x36f   :  { %978 = dma.done.wait [#allocation4], 8192  }
 0x370   :  { %979 = vsyncadd [#allocation4], 4294959104 }
 0x371   :  { %887 = vsyncpa [#allocation3], 1 }
 0x372   :  { %888 = vsyncpa [#allocation4], 1 }

</bundles_post_ra>
